<compile_context>
chip_gen: v7x
topology: tpu7x:2x2x1
jax: 0.10.0
libtpu: 0.0.40
codegen_flags: <defaults>
</compile_context>

<pallas_src>
import numpy as np
import jax
import jax.numpy as jnp
from jax import lax
from jax.experimental import pallas as pl
from jax.experimental.pallas import tpu as pltpu


def _sigmoid(z):
    # logistic via tanh: numerically stable, and tanh lands on the EUP slot
    # (no VALU divide in the gate math).
    return 0.5 * (jnp.tanh(0.5 * z) + 1.0)


def _decoder_step_math(idx, enc, h0, c0, emb_tbl_ref, small_ref, wlstm_ref, wfc_ref):
    """One attention + LSTM-cell + fc step; all operands already in VMEM/registers.

    idx : (N, 1) int32 token ids
    enc : (S, N, 2H) f32 encoder states
    h0, c0 : (N, H) f32 recurrent state
    emb_tbl_ref : (V, E) embedding table
    small_ref   : (5, W) packed row vectors
                  row0[:2H] = W_energy[:, H:3H]   row1[:H] = W_energy[:, :H]
                  row2[0]   = b_energy            row3[:4H] = b_ih + b_hh
                  row4[:OUT]= b_fc
    wlstm_ref   : (2H+E+H, 4H) = [W_ih[:, :2H].T ; W_ih[:, 2H:].T ; W_hh.T]
    wfc_ref     : (H, OUT) = W_fc.T
    """
    N, H = h0.shape
    twoH = 2 * H
    V, E = emb_tbl_ref.shape
    OUT = wfc_ref.shape[1]

    # ---- embedding lookup: one-hot @ table on the MXU (no gather) ----------
    # TODO(synk): at realistic vocab sizes (V >= few hundred) replace with a
    # scalar-prefetched row gather / manual DMA instead of the O(N*V) one-hot.
    vocab_iota = lax.broadcasted_iota(jnp.int32, (N, V), 1)
    onehot = (vocab_iota == idx).astype(jnp.float32)                 # (N, V)
    emb = jnp.dot(onehot, emb_tbl_ref[...],
                  preferred_element_type=jnp.float32)                # (N, E)
    # TODO(synk): nn.Dropout(p) on the embedding is inference-mode identity here.

    # ---- attention energies: relu(W_e @ [h ; enc] + b), concat-free --------
    we_e = small_ref[0:1, 0:twoH]                                    # (1, 2H)
    we_h = small_ref[1:2, 0:H]                                       # (1, H)
    be = small_ref[2:3, 0:1]                                         # (1, 1)
    h_term = jnp.sum(h0 * we_h, axis=-1, keepdims=True)              # (N, 1)
    enc_term = jnp.sum(enc * we_e[None], axis=-1, keepdims=True)     # (S, N, 1)
    energy = jnp.maximum(enc_term + h_term[None] + be[None], 0.0)    # (S, N, 1)

    # ---- softmax over the sequence axis (dim 0); exact divide (tolerance) --
    m = jnp.max(energy, axis=0, keepdims=True)
    e = jnp.exp(energy - m)
    att = e / jnp.sum(e, axis=0, keepdims=True)                      # (S, N, 1)

    # ---- context vector: einsum('snk,snl->knl') ----------------------------
    ctx = jnp.sum(att * enc, axis=0)                                 # (N, 2H)

    # ---- single LSTM cell step (PyTorch gate order i, f, g, o) -------------
    # rnn_input = cat(ctx, emb) is never materialized: W_ih is pre-split.
    # TODO(synk): for scaled-up configs cast matmul operands to bf16 (keep
    # preferred_element_type=f32) per the v6e/v7x recommendation.
    w_ctx = wlstm_ref[0:twoH, :]
    w_emb = wlstm_ref[twoH:twoH + E, :]
    w_hh = wlstm_ref[twoH + E:twoH + E + H, :]
    b_lstm = small_ref[3:4, 0:4 * H]
    gates = (jnp.dot(ctx, w_ctx, preferred_element_type=jnp.float32)
             + jnp.dot(emb, w_emb, preferred_element_type=jnp.float32)
             + jnp.dot(h0, w_hh, preferred_element_type=jnp.float32)
             + b_lstm)                                               # (N, 4H)
    i = _sigmoid(gates[:, 0:H])
    f = _sigmoid(gates[:, H:2 * H])
    g = jnp.tanh(gates[:, 2 * H:3 * H])
    o = _sigmoid(gates[:, 3 * H:4 * H])
    c_new = f * c0 + i * g
    h_new = o * jnp.tanh(c_new)

    # ---- output projection ---------------------------------------------------
    bfc = small_ref[4:5, 0:OUT]
    pred = jnp.dot(h_new, wfc_ref[...],
                   preferred_element_type=jnp.float32) + bfc         # (N, OUT)
    return pred, h_new, c_new


def _pack_slab(pred, h_new, c_new, slab_width):
    """Pack [pred | h | c | zeros] into one lane-dense slab for a single store."""
    N = pred.shape[0]
    used = pred.shape[1] + h_new.shape[1] + c_new.shape[1]
    parts = [pred, h_new, c_new]
    if slab_width > used:
        parts.append(jnp.zeros((N, slab_width - used), jnp.float32))
    return jnp.concatenate(parts, axis=-1)


# ------------------------------ kernels -------------------------------------
def decoder_step_kernel(x_ref, enc_ref, h0_ref, c0_ref,
                        emb_ref, small_ref, wlstm_ref, wfc_ref, out_ref):
    """Single decode step; whole problem lives in VMEM (un-gridded)."""
    pred, h_new, c_new = _decoder_step_math(
        x_ref[...], enc_ref[...], h0_ref[...], c0_ref[...],
        emb_ref, small_ref, wlstm_ref, wfc_ref)
    out_ref[...] = _pack_slab(pred, h_new, c_new, out_ref.shape[-1])


def decoder_fused_kernel(x_ref, enc_ref, h0_ref, c0_ref,
                         emb_ref, small_ref, wlstm_ref, wfc_ref,
                         out_ref, h_scr, c_scr):
    """T teacher-forced decode steps: grid over time, state carried in VMEM scratch,
    weights + encoder states resident in VMEM across the whole grid."""
    t = pl.program_id(0)

    @pl.when(t == 0)
    def _():
        h_scr[...] = h0_ref[...]
        c_scr[...] = c0_ref[...]

    pred, h_new, c_new = _decoder_step_math(
        x_ref[0], enc_ref[...], h_scr[...], c_scr[...],
        emb_ref, small_ref, wlstm_ref, wfc_ref)
    h_scr[...] = h_new
    c_scr[...] = c_new
    out_ref[0] = _pack_slab(pred, h_new, c_new, out_ref.shape[-1])


# --------------------------- one-time param prep ----------------------------
def prepare_decoder_params(params):
    """One-time layout plumbing (hoisted out of the decode loop).

    Call once; reuse the returned dict for every decode step / fused call.
    """
    emb_tbl = jnp.asarray(params["embedding"], jnp.float32)          # (V, E)
    w_fc = jnp.asarray(params["w_fc"], jnp.float32)                  # (OUT, H)
    OUT, H = w_fc.shape
    twoH = 2 * H
    E = emb_tbl.shape[1]

    we = jnp.asarray(params["w_energy"], jnp.float32).reshape(-1)    # (3H,)
    width = max(twoH, 4 * H, OUT, 1)
    small = jnp.zeros((5, width), jnp.float32)
    small = small.at[0, :twoH].set(we[H:])                           # enc part of energy
    small = small.at[1, :H].set(we[:H])                              # hidden part of energy
    small = small.at[2, 0].set(jnp.asarray(params["b_energy"],
                                           jnp.float32).reshape(-1)[0])
    small = small.at[3, :4 * H].set(jnp.asarray(params["b_ih"], jnp.float32)
                                    + jnp.asarray(params["b_hh"], jnp.float32))
    small = small.at[4, :OUT].set(jnp.asarray(params["b_fc"], jnp.float32))

    wih = jnp.asarray(params["w_ih"], jnp.float32)                   # (4H, 2H+E)
    w_lstm = jnp.concatenate(
        [wih[:, :twoH].T, wih[:, twoH:].T,
         jnp.asarray(params["w_hh"], jnp.float32).T], axis=0)        # (2H+E+H, 4H)

    slab = ((OUT + twoH + 127) // 128) * 128                         # lane-dense output width
    # TODO(synk): at realistic V/S/N sizes guard the all-in-VMEM assumption
    # (v7x scoped VMEM default is 32 MiB) and move to a gridded BlockSpec pipeline.
    return {
        "emb_tbl": emb_tbl, "small": small, "w_lstm": w_lstm, "w_fc": w_fc.T,
        "out_size": OUT, "hidden_size": H, "emb_size": E, "slab": slab,
    }


# ------------------------------- wrappers ------------------------------------
def decoder_forward(x_idx, encoder_states, hidden, cell, prep):
    """Single decode step matching Decoder.forward.
    x_idx: (N,) int32; encoder_states: (S, N, 2H); hidden/cell: (1, N, H)."""
    S, N, twoH = encoder_states.shape
    H = prep["hidden_size"]
    OUT = prep["out_size"]
    SLAB = prep["slab"]
    vmem = pl.BlockSpec(memory_space=pltpu.MemorySpace.VMEM)

    slab = pl.pallas_call(
        decoder_step_kernel,
        out_shape=jax.ShapeDtypeStruct((N, SLAB), jnp.float32),
        in_specs=[vmem] * 8,
        out_specs=vmem,
    )(x_idx.reshape(N, 1).astype(jnp.int32), encoder_states,
      hidden[0], cell[0],
      prep["emb_tbl"], prep["small"], prep["w_lstm"], prep["w_fc"])

    pred = slab[:, :OUT]                                             # (N, OUT)
    h_new = slab[:, OUT:OUT + H][None]                               # (1, N, H)
    c_new = slab[:, OUT + H:OUT + 2 * H][None]                       # (1, N, H)
    return pred, h_new, c_new


def decoder_forward_fused(tokens, encoder_states, hidden, cell, prep):
    """T teacher-forced decode steps in ONE pallas_call (equivalent to calling
    Decoder.forward T times with the given tokens)."""
    T, N = tokens.shape
    S, _, twoH = encoder_states.shape
    H = prep["hidden_size"]
    E = prep["emb_size"]
    V = prep["emb_tbl"].shape[0]
    OUT = prep["out_size"]
    SLAB = prep["slab"]
    small = prep["small"]
    w_lstm = prep["w_lstm"]

    grid_spec = pltpu.PrefetchScalarGridSpec(
        num_scalar_prefetch=0,
        grid=(T,),
        in_specs=[
            pl.BlockSpec((1, N, 1), lambda t: (t, 0, 0)),            # token of step t
            pl.BlockSpec((S, N, twoH), lambda t: (0, 0, 0)),         # enc (resident)
            pl.BlockSpec((N, H), lambda t: (0, 0)),                  # h0
            pl.BlockSpec((N, H), lambda t: (0, 0)),                  # c0
            pl.BlockSpec((V, E), lambda t: (0, 0)),                  # embedding table
            pl.BlockSpec(small.shape, lambda t: (0, 0)),             # packed biases
            pl.BlockSpec(w_lstm.shape, lambda t: (0, 0)),            # packed LSTM weights
            pl.BlockSpec((H, OUT), lambda t: (0, 0)),                # fc weight
        ],
        out_specs=pl.BlockSpec((1, N, SLAB), lambda t: (t, 0, 0)),
        scratch_shapes=[pltpu.VMEM((N, H), jnp.float32),
                        pltpu.VMEM((N, H), jnp.float32)],
    )
    slab = pl.pallas_call(
        decoder_fused_kernel,
        out_shape=jax.ShapeDtypeStruct((T, N, SLAB), jnp.float32),
        grid_spec=grid_spec,
        compiler_params=pltpu.CompilerParams(
            dimension_semantics=("arbitrary",)),                     # time carries state
    )(tokens.reshape(T, N, 1).astype(jnp.int32), encoder_states,
      hidden[0], cell[0],
      prep["emb_tbl"], small, w_lstm, prep["w_fc"])

    preds = slab[:, :, :OUT]                                         # (T, N, OUT)
    h_new = slab[-1, :, OUT:OUT + H][None]                           # (1, N, H)
    c_new = slab[-1, :, OUT + H:OUT + 2 * H][None]                   # (1, N, H)
    return preds, h_new, c_new


# ---------------------------- pure-JAX reference ----------------------------
def reference_forward(x_idx, encoder_states, hidden, cell, params):
    H = hidden.shape[-1]
    emb = params["embedding"][x_idx]                                 # (N, E)
    embedding = emb[None]                                            # (1, N, E)
    S = encoder_states.shape[0]
    h_rep = jnp.tile(hidden, (S, 1, 1))                              # (S, N, H)
    cat = jnp.concatenate([h_rep, encoder_states], axis=2)           # (S, N, 3H)
    energy = jax.nn.relu(cat @ params["w_energy"].T + params["b_energy"])
    attention = jax.nn.softmax(energy, axis=0)                       # (S, N, 1)
    context = jnp.einsum('snk,snl->knl', attention, encoder_states)  # (1, N, 2H)
    rnn_input = jnp.concatenate([context, embedding], axis=2)        # (1, N, 2H+E)

    h0, c0 = hidden[0], cell[0]
    gates = (rnn_input[0] @ params["w_ih"].T + h0 @ params["w_hh"].T
             + params["b_ih"] + params["b_hh"])
    i = jax.nn.sigmoid(gates[:, 0:H])
    f = jax.nn.sigmoid(gates[:, H:2 * H])
    g = jnp.tanh(gates[:, 2 * H:3 * H])
    o = jax.nn.sigmoid(gates[:, 3 * H:4 * H])
    c_new = f * c0 + i * g
    h_new = o * jnp.tanh(c_new)

    predictions = h_new @ params["w_fc"].T + params["b_fc"]          # (N, OUT)
    return predictions, h_new[None], c_new[None]


# ------------------------------- param setup --------------------------------
def make_params(key, input_size, embedding_size, hidden_size, output_size):
    """Deterministic synthetic parameters with PyTorch-style shapes."""
    H = hidden_size
    E = embedding_size
    ks = jax.random.split(key, 9)

    def u(k, shape, bound):
        return jax.random.uniform(k, shape, jnp.float32, -bound, bound)

    b_energy = 1.0 / np.sqrt(3 * H)
    b_lstm = 1.0 / np.sqrt(H)
    b_fc = 1.0 / np.sqrt(H)

    return {
        "embedding": jax.random.normal(ks[0], (input_size, E), jnp.float32),
        "w_energy": u(ks[1], (1, 3 * H), b_energy),
        "b_energy": u(ks[2], (1,), b_energy),
        "w_ih": u(ks[3], (4 * H, 2 * H + E), b_lstm),
        "w_hh": u(ks[4], (4 * H, H), b_lstm),
        "b_ih": u(ks[5], (4 * H,), b_lstm),
        "b_hh": u(ks[6], (4 * H,), b_lstm),
        "w_fc": u(ks[7], (output_size, H), b_fc),
        "b_fc": u(ks[8], (output_size,), b_fc),
    }


if __name__ == "__main__":
    INPUT_SIZE = 32      # target vocabulary
    EMB = 8
    HIDDEN = 16          # LSTM hidden size  (encoder_states feature dim = 2*HIDDEN)
    OUTPUT_SIZE = 32
    S, N, T = 8, 2, 8    # source length, batch, fused decode steps
    # NOTE: the module's own forward is only shape-consistent for num_layers=1.

    root = jax.random.PRNGKey(0)
    k_p, k_x, k_e, k_h, k_c, k_t = jax.random.split(root, 6)

    params = make_params(k_p, INPUT_SIZE, EMB, HIDDEN, OUTPUT_SIZE)
    prep = prepare_decoder_params(params)            # one-time, hoisted out of the loop

    x = jax.random.randint(k_x, (N,), 0, INPUT_SIZE, jnp.int32)
    encoder_states = jax.random.normal(k_e, (S, N, 2 * HIDDEN), jnp.float32)
    hidden = jax.random.normal(k_h, (1, N, HIDDEN), jnp.float32)
    cell = jax.random.normal(k_c, (1, N, HIDDEN), jnp.float32)

    # ---- single step (module-equivalent) ----
    pred, h_new, c_new = decoder_forward(x, encoder_states, hidden, cell, prep)
    pred = jax.block_until_ready(pred)
    h_new = jax.block_until_ready(h_new)
    c_new = jax.block_until_ready(c_new)

    pred_r, h_r, c_r = reference_forward(x, encoder_states, hidden, cell, params)
    pred_r = jax.block_until_ready(pred_r)

    assert pred.shape == (N, OUTPUT_SIZE)
    assert h_new.shape == (1, N, HIDDEN) and c_new.shape == (1, N, HIDDEN)
    np.testing.assert_allclose(np.asarray(pred), np.asarray(pred_r),
                               rtol=1e-4, atol=1e-5)
    np.testing.assert_allclose(np.asarray(h_new), np.asarray(h_r),
                               rtol=1e-4, atol=1e-5)
    np.testing.assert_allclose(np.asarray(c_new), np.asarray(c_r),
                               rtol=1e-4, atol=1e-5)

    # ---- fused T-step decode (teacher forcing) vs T sequential reference steps ----
    tokens = jax.random.randint(k_t, (T, N), 0, INPUT_SIZE, jnp.int32)
    preds_f, h_f, c_f = decoder_forward_fused(tokens, encoder_states, hidden, cell, prep)
    preds_f = jax.block_until_ready(preds_f)
    h_f = jax.block_until_ready(h_f)
    c_f = jax.block_until_ready(c_f)

    h_seq, c_seq = hidden, cell
    preds_seq = []
    for t in range(T):
        p_t, h_seq, c_seq = reference_forward(tokens[t], encoder_states,
                                              h_seq, c_seq, params)
        preds_seq.append(p_t)
    preds_seq = jnp.stack(preds_seq, axis=0)

    assert preds_f.shape == (T, N, OUTPUT_SIZE)
    np.testing.assert_allclose(np.asarray(preds_f), np.asarray(preds_seq),
                               rtol=1e-4, atol=1e-4)
    np.testing.assert_allclose(np.asarray(h_f), np.asarray(h_seq),
                               rtol=1e-4, atol=1e-4)
    np.testing.assert_allclose(np.asarray(c_f), np.asarray(c_seq),
                               rtol=1e-4, atol=1e-4)

    print("KERNEL_OK")
</pallas_src>

<mosaic_0001>
module attributes {stable_mosaic.version = 11 : i64} {
  func.func @decoder_step_kernel(%arg0: memref<2x1xi32, #tpu.memory_space<vmem>>, %arg1: memref<8x2x32xf32, #tpu.memory_space<vmem>>, %arg2: memref<2x16xf32, #tpu.memory_space<vmem>>, %arg3: memref<2x16xf32, #tpu.memory_space<vmem>>, %arg4: memref<32x8xf32, #tpu.memory_space<vmem>>, %arg5: memref<5x64xf32, #tpu.memory_space<vmem>>, %arg6: memref<56x64xf32, #tpu.memory_space<vmem>>, %arg7: memref<16x32xf32, #tpu.memory_space<vmem>>, %arg8: memref<2x128xf32, #tpu.memory_space<vmem>>) attributes {dimension_semantics = [], scalar_prefetch = 0 : i64, scratch_operands = 0 : i64, tpu.core_type = #tpu.core_type<tc>} {
    %c0 = arith.constant 0 : index
    %c0_0 = arith.constant 0 : index
    %0 = vector.load %arg0[%c0, %c0_0] : memref<2x1xi32, #tpu.memory_space<vmem>>, vector<2x1xi32>
    %c0_1 = arith.constant 0 : index
    %c0_2 = arith.constant 0 : index
    %c0_3 = arith.constant 0 : index
    %1 = vector.load %arg1[%c0_1, %c0_2, %c0_3] : memref<8x2x32xf32, #tpu.memory_space<vmem>>, vector<8x2x32xf32>
    %c0_4 = arith.constant 0 : index
    %c0_5 = arith.constant 0 : index
    %2 = vector.load %arg2[%c0_4, %c0_5] : memref<2x16xf32, #tpu.memory_space<vmem>>, vector<2x16xf32>
    %c0_6 = arith.constant 0 : index
    %c0_7 = arith.constant 0 : index
    %3 = vector.load %arg3[%c0_6, %c0_7] : memref<2x16xf32, #tpu.memory_space<vmem>>, vector<2x16xf32>
    %4 = tpu.iota {dimensions = array<i32: 1>} : vector<2x32xi32>
    %5 = vector.broadcast %0 : vector<2x1xi32> to vector<2x32xi32>
    %6 = arith.cmpi eq, %4, %5 : vector<2x32xi32>
    %7 = arith.extui %6 : vector<2x32xi1> to vector<2x32xi32>
    %8 = arith.sitofp %7 : vector<2x32xi32> to vector<2x32xf32>
    %c0_8 = arith.constant 0 : index
    %c0_9 = arith.constant 0 : index
    %9 = vector.load %arg4[%c0_8, %c0_9] : memref<32x8xf32, #tpu.memory_space<vmem>>, vector<32x8xf32>
    %cst = arith.constant dense<0.000000e+00> : vector<2x8xf32>
    %10 = tpu.matmul %8, %9, %cst {dimension_numbers = #tpu.dot_dimension_numbers<[1], [0], [0], [1], [0, 0, 1, 1], [], []>} : vector<2x32xf32>, vector<32x8xf32>, vector<2x8xf32> -> vector<2x8xf32>
    %c0_10 = arith.constant 0 : index
    %c0_11 = arith.constant 0 : index
    %11 = vector.load %arg5[%c0_10, %c0_11] : memref<5x64xf32, #tpu.memory_space<vmem>>, vector<1x32xf32>
    %c1 = arith.constant 1 : index
    %c0_12 = arith.constant 0 : index
    %12 = vector.load %arg5[%c1, %c0_12] : memref<5x64xf32, #tpu.memory_space<vmem>>, vector<1x16xf32>
    %c2 = arith.constant 2 : index
    %c0_13 = arith.constant 0 : index
    %13 = vector.load %arg5[%c2, %c0_13] : memref<5x64xf32, #tpu.memory_space<vmem>>, vector<1x1xf32>
    %14 = vector.broadcast %12 : vector<1x16xf32> to vector<2x16xf32>
    %15 = arith.mulf %2, %14 : vector<2x16xf32>
    %cst_14 = arith.constant dense<0.000000e+00> : vector<2xf32>
    %16 = vector.multi_reduction <add>, %15, %cst_14 [1] : vector<2x16xf32> to vector<2xf32>
    %17 = vector.shape_cast %16 : vector<2xf32> to vector<2x1xf32>
    %18 = vector.shape_cast %11 : vector<1x32xf32> to vector<1x1x32xf32>
    %19 = vector.broadcast %18 : vector<1x1x32xf32> to vector<8x2x32xf32>
    %20 = arith.mulf %1, %19 : vector<8x2x32xf32>
    %cst_15 = arith.constant dense<0.000000e+00> : vector<8x2xf32>
    %21 = vector.multi_reduction <add>, %20, %cst_15 [2] : vector<8x2x32xf32> to vector<8x2xf32>
    %22 = vector.shape_cast %21 : vector<8x2xf32> to vector<8x2x1xf32>
    %23 = vector.shape_cast %17 : vector<2x1xf32> to vector<1x2x1xf32>
    %24 = vector.broadcast %23 : vector<1x2x1xf32> to vector<8x2x1xf32>
    %25 = arith.addf %22, %24 : vector<8x2x1xf32>
    %26 = vector.shape_cast %13 : vector<1x1xf32> to vector<1x1x1xf32>
    %27 = vector.broadcast %26 : vector<1x1x1xf32> to vector<8x2x1xf32>
    %28 = arith.addf %25, %27 : vector<8x2x1xf32>
    %cst_16 = arith.constant 0.000000e+00 : f32
    %29 = vector.broadcast %cst_16 : f32 to vector<8x2x1xf32>
    %30 = arith.maximumf %28, %29 : vector<8x2x1xf32>
    %cst_17 = arith.constant dense<0xFF800000> : vector<2x1xf32>
    %31 = vector.multi_reduction <maximumf>, %30, %cst_17 [0] : vector<8x2x1xf32> to vector<2x1xf32>
    %32 = vector.shape_cast %31 : vector<2x1xf32> to vector<1x2x1xf32>
    %33 = vector.broadcast %32 : vector<1x2x1xf32> to vector<8x2x1xf32>
    %34 = arith.subf %30, %33 : vector<8x2x1xf32>
    %35 = math.exp %34 : vector<8x2x1xf32>
    %cst_18 = arith.constant dense<0.000000e+00> : vector<2x1xf32>
    %36 = vector.multi_reduction <add>, %35, %cst_18 [0] : vector<8x2x1xf32> to vector<2x1xf32>
    %37 = vector.shape_cast %36 : vector<2x1xf32> to vector<1x2x1xf32>
    %38 = vector.broadcast %37 : vector<1x2x1xf32> to vector<8x2x1xf32>
    %39 = arith.divf %35, %38 : vector<8x2x1xf32>
    %40 = vector.broadcast %39 : vector<8x2x1xf32> to vector<8x2x32xf32>
    %41 = arith.mulf %40, %1 : vector<8x2x32xf32>
    %cst_19 = arith.constant dense<0.000000e+00> : vector<2x32xf32>
    %42 = vector.multi_reduction <add>, %41, %cst_19 [0] : vector<8x2x32xf32> to vector<2x32xf32>
    %c0_20 = arith.constant 0 : index
    %c0_21 = arith.constant 0 : index
    %43 = vector.load %arg6[%c0_20, %c0_21] : memref<56x64xf32, #tpu.memory_space<vmem>>, vector<32x64xf32>
    %c32 = arith.constant 32 : index
    %c0_22 = arith.constant 0 : index
    %44 = vector.load %arg6[%c32, %c0_22] : memref<56x64xf32, #tpu.memory_space<vmem>>, vector<8x64xf32>
    %c40 = arith.constant 40 : index
    %c0_23 = arith.constant 0 : index
    %45 = vector.load %arg6[%c40, %c0_23] : memref<56x64xf32, #tpu.memory_space<vmem>>, vector<16x64xf32>
    %c3 = arith.constant 3 : index
    %c0_24 = arith.constant 0 : index
    %46 = vector.load %arg5[%c3, %c0_24] : memref<5x64xf32, #tpu.memory_space<vmem>>, vector<1x64xf32>
    %cst_25 = arith.constant dense<0.000000e+00> : vector<2x64xf32>
    %47 = tpu.matmul %42, %43, %cst_25 {dimension_numbers = #tpu.dot_dimension_numbers<[1], [0], [0], [1], [0, 0, 1, 1], [], []>} : vector<2x32xf32>, vector<32x64xf32>, vector<2x64xf32> -> vector<2x64xf32>
    %cst_26 = arith.constant dense<0.000000e+00> : vector<2x64xf32>
    %48 = tpu.matmul %10, %44, %cst_26 {dimension_numbers = #tpu.dot_dimension_numbers<[1], [0], [0], [1], [0, 0, 1, 1], [], []>} : vector<2x8xf32>, vector<8x64xf32>, vector<2x64xf32> -> vector<2x64xf32>
    %49 = arith.addf %47, %48 : vector<2x64xf32>
    %cst_27 = arith.constant dense<0.000000e+00> : vector<2x64xf32>
    %50 = tpu.matmul %2, %45, %cst_27 {dimension_numbers = #tpu.dot_dimension_numbers<[1], [0], [0], [1], [0, 0, 1, 1], [], []>} : vector<2x16xf32>, vector<16x64xf32>, vector<2x64xf32> -> vector<2x64xf32>
    %51 = arith.addf %49, %50 : vector<2x64xf32>
    %52 = vector.broadcast %46 : vector<1x64xf32> to vector<2x64xf32>
    %53 = arith.addf %51, %52 : vector<2x64xf32>
    %54 = vector.extract_strided_slice %53 {offsets = [0, 0], sizes = [2, 16], strides = [1, 1]} : vector<2x64xf32> to vector<2x16xf32>
    %cst_28 = arith.constant 5.000000e-01 : f32
    %55 = vector.broadcast %cst_28 : f32 to vector<2x16xf32>
    %56 = arith.mulf %55, %54 : vector<2x16xf32>
    %57 = math.tanh %56 : vector<2x16xf32>
    %cst_29 = arith.constant 1.000000e+00 : f32
    %58 = vector.broadcast %cst_29 : f32 to vector<2x16xf32>
    %59 = arith.addf %57, %58 : vector<2x16xf32>
    %cst_30 = arith.constant 5.000000e-01 : f32
    %60 = vector.broadcast %cst_30 : f32 to vector<2x16xf32>
    %61 = arith.mulf %60, %59 : vector<2x16xf32>
    %62 = vector.extract_strided_slice %53 {offsets = [0, 16], sizes = [2, 16], strides = [1, 1]} : vector<2x64xf32> to vector<2x16xf32>
    %cst_31 = arith.constant 5.000000e-01 : f32
    %63 = vector.broadcast %cst_31 : f32 to vector<2x16xf32>
    %64 = arith.mulf %63, %62 : vector<2x16xf32>
    %65 = math.tanh %64 : vector<2x16xf32>
    %cst_32 = arith.constant 1.000000e+00 : f32
    %66 = vector.broadcast %cst_32 : f32 to vector<2x16xf32>
    %67 = arith.addf %65, %66 : vector<2x16xf32>
    %cst_33 = arith.constant 5.000000e-01 : f32
    %68 = vector.broadcast %cst_33 : f32 to vector<2x16xf32>
    %69 = arith.mulf %68, %67 : vector<2x16xf32>
    %70 = vector.extract_strided_slice %53 {offsets = [0, 32], sizes = [2, 16], strides = [1, 1]} : vector<2x64xf32> to vector<2x16xf32>
    %71 = math.tanh %70 : vector<2x16xf32>
    %72 = vector.extract_strided_slice %53 {offsets = [0, 48], sizes = [2, 16], strides = [1, 1]} : vector<2x64xf32> to vector<2x16xf32>
    %cst_34 = arith.constant 5.000000e-01 : f32
    %73 = vector.broadcast %cst_34 : f32 to vector<2x16xf32>
    %74 = arith.mulf %73, %72 : vector<2x16xf32>
    %75 = math.tanh %74 : vector<2x16xf32>
    %cst_35 = arith.constant 1.000000e+00 : f32
    %76 = vector.broadcast %cst_35 : f32 to vector<2x16xf32>
    %77 = arith.addf %75, %76 : vector<2x16xf32>
    %cst_36 = arith.constant 5.000000e-01 : f32
    %78 = vector.broadcast %cst_36 : f32 to vector<2x16xf32>
    %79 = arith.mulf %78, %77 : vector<2x16xf32>
    %80 = arith.mulf %69, %3 : vector<2x16xf32>
    %81 = arith.mulf %61, %71 : vector<2x16xf32>
    %82 = arith.addf %80, %81 : vector<2x16xf32>
    %83 = math.tanh %82 : vector<2x16xf32>
    %84 = arith.mulf %79, %83 : vector<2x16xf32>
    %c4 = arith.constant 4 : index
    %c0_37 = arith.constant 0 : index
    %85 = vector.load %arg5[%c4, %c0_37] : memref<5x64xf32, #tpu.memory_space<vmem>>, vector<1x32xf32>
    %c0_38 = arith.constant 0 : index
    %c0_39 = arith.constant 0 : index
    %86 = vector.load %arg7[%c0_38, %c0_39] : memref<16x32xf32, #tpu.memory_space<vmem>>, vector<16x32xf32>
    %cst_40 = arith.constant dense<0.000000e+00> : vector<2x32xf32>
    %87 = tpu.matmul %84, %86, %cst_40 {dimension_numbers = #tpu.dot_dimension_numbers<[1], [0], [0], [1], [0, 0, 1, 1], [], []>} : vector<2x16xf32>, vector<16x32xf32>, vector<2x32xf32> -> vector<2x32xf32>
    %88 = vector.broadcast %85 : vector<1x32xf32> to vector<2x32xf32>
    %89 = arith.addf %87, %88 : vector<2x32xf32>
    %cst_41 = arith.constant 0.000000e+00 : f32
    %90 = vector.broadcast %cst_41 : f32 to vector<2x64xf32>
    %91 = tpu.concatenate %89, %84, %82, %90 in 1 : vector<2x32xf32>, vector<2x16xf32>, vector<2x16xf32>, vector<2x64xf32> -> vector<2x128xf32>
    %c0_42 = arith.constant 0 : index
    %c0_43 = arith.constant 0 : index
    %92 = vector.load %arg8[%c0_42, %c0_43] : memref<2x128xf32, #tpu.memory_space<vmem>>, vector<2x128xf32>
    tpu.vector_store %arg8[%c0_42, %c0_43], %91 {strides = array<i32>} : memref<2x128xf32, #tpu.memory_space<vmem>>, vector<2x128xf32>,
    return
  }
}

</mosaic_0001>

<bundles_post_ra>
// kernel: tpu_custom_call.1
= control target key start
LH: loop header
LB: loop body
LE: loop exit
PB: predicated region body
PF: predicated region fallthrough
CT: control target
= control target key end

     0   :  { %13 = vsyncpa [#allocation3], 0  ;;  %s1233_s0 = inlined_call_operand.vmem [shape: s32[2,1], index: 0, kind: input, shape index: {}]   ;;  %s1234_s1 = inlined_call_operand.hbm [shape: f32[8,2,32], index: 1, kind: input, shape index: {}]   ;;  %s1235_s2 = inlined_call_operand.vmem [shape: f32[2,16], index: 2, kind: input, shape index: {}]   ;;  %s1236_s3 = inlined_call_operand.hbm [shape: f32[2,16], index: 3, kind: input, shape index: {}]   ;;  %s1237_s4 = inlined_call_operand.vmem [shape: f32[32,8], index: 4, kind: input, shape index: {}]   ;;  %s1238_s5 = inlined_call_operand.vmem [shape: f32[5,64], index: 5, kind: input, shape index: {}]   ;;  %s1239_s6 = inlined_call_operand.vmem [shape: f32[56,64], index: 6, kind: input, shape index: {}]   ;;  %s1240_s7 = inlined_call_operand.hbm [shape: f32[16,32], index: 7, kind: input, shape index: {}]   ;;  %s1241_s8 = inlined_call_operand.hbm [shape: f32[2,128], index: 8, kind: output, shape index: {}]  }
   0x1   :  { %14 = vsyncpa [#allocation6], 0 }
   0x2   :  { %15 = vsyncpa [#allocation4], 0  ;;  %s966_s27 = smov [#allocation5]   ;;  %s967_s29 = smov [#allocation2]  }
   0x3   :  { %s38_s28 = sshll.u32 %s966_s27, 4  ;;  %s23_s30 = sshll.u32 %s967_s29, 4  ;;  %s39_s28 = int_to_ptr.vmem [resolvable:$true] %s38_s28  ;;  %s1027_s30 = int_to_ptr.vmem [resolvable:$true] %s23_s30 }
   0x4   :  { %s872_s11 = scalar_lea.hbm %s1236_s3, 32 }
   0x5   :  { %p873_p0 = scmp.ne.s32.totalorder %s1236_s3, %s872_s11  ;;  %p876_p1 = scmp.lt.u32.totalorder %s872_s11, %s1236_s3 }
   0x7   :  { %p878_p2 = pnand %p876_p1, %p873_p0 }
   0x9   :  { %881 = shalt.err (!%p878_p2)
}
   0xa   :  { %s882_s16 = scalar_lea.vmem %s39_s28, 32  ;;  %p887_p4 = scmp.lt.s32.totalorder %s39_s28, %s39_s28 }
   0xb   :  { %p883_p3 = scmp.ne.s32.totalorder %s39_s28, %s882_s16  ;;  %p888_p5 = scmp.lt.s32.totalorder %s882_s16, %s882_s16 }
   0xd   :  { %p889_p6 = por %p888_p5, %p887_p4 }
   0xf   :  { %p890_p7 = pnand %p889_p6, %p883_p3 }
  0x11   :  { %893 = shalt.err (!%p890_p7)
}
  0x12   :  { %41 = dma.hbm_to_vmem [thread:$0]  %s1236_s3, 32, %s39_s28, [#allocation6]  }
  0x13   :  { %s894_s21 = scalar_lea.hbm %s1234_s1, 256 }
  0x14   :  { %p895_p8 = scmp.ne.s32.totalorder %s1234_s1, %s894_s21  ;;  %p898_p9 = scmp.lt.u32.totalorder %s894_s21, %s1234_s1 }
  0x16   :  { %p900_p10 = pnand %p898_p9, %p895_p8 }
  0x18   :  { %903 = shalt.err (!%p900_p10)
}
  0x19   :  { %s904_s26 = scalar_lea.vmem %s1027_s30, 256  ;;  %p909_p12 = scmp.lt.s32.totalorder %s1027_s30, %s1027_s30 }
  0x1a   :  { %p905_p11 = scmp.ne.s32.totalorder %s1027_s30, %s904_s26  ;;  %p910_p13 = scmp.lt.s32.totalorder %s904_s26, %s904_s26 }
  0x1c   :  { %p911_p0 = por %p910_p13, %p909_p12 }
  0x1e   :  { %p912_p1 = pnand %p911_p0, %p905_p11 }
  0x20   :  { %915 = shalt.err (!%p912_p1)
}
  0x21   :  { %s968_s3 = smov 32   ;;  %s969_s27 = smov 2  }
  0x22   :  { %29 = dma.hbm_to_vmem [thread:$0]  %s1234_s1, 256, %s1027_s30, [#allocation3], %s968_s3, %s968_s3, %s969_s27  }
  0x23   :  { %s970_s9 = smov [#allocation7]   ;;  %s916_s13 = scalar_lea.hbm %s1240_s7, 256 }
  0x24   :  { %s53_s10 = sshll.u32 %s970_s9, 4  ;;  %p917_p2 = scmp.ne.s32.totalorder %s1240_s7, %s916_s13  ;;  %s54_s10 = int_to_ptr.vmem [resolvable:$true] %s53_s10 }
  0x25   :  { %p920_p3 = scmp.lt.u32.totalorder %s916_s13, %s1240_s7 }
  0x27   :  { %p922_p4 = pnand %p920_p3, %p917_p2 }
  0x29   :  { %925 = shalt.err (!%p922_p4)
}
  0x2a   :  { %s926_s18 = scalar_lea.vmem %s54_s10, 256  ;;  %p931_p6 = scmp.lt.s32.totalorder %s54_s10, %s54_s10 }
  0x2b   :  { %p927_p5 = scmp.ne.s32.totalorder %s54_s10, %s926_s18  ;;  %p932_p7 = scmp.lt.s32.totalorder %s926_s18, %s926_s18 }
  0x2d   :  { %p933_p8 = por %p932_p7, %p931_p6 }
  0x2f   :  { %p934_p9 = pnand %p933_p8, %p927_p5 }
  0x31   :  { %937 = shalt.err (!%p934_p9)
}
  0x32   :  { %s971_s1 = smov 128   ;;  %s972_s30 = smov 8  }
  0x33   :  { %59 = dma.hbm_to_vmem [thread:$0]  %s1240_s7, 256, %s54_s10, [#allocation6], %s971_s1, %s971_s1, %s972_s30  }
  0x34   :  { %960 = dma.done.wait [#allocation3], 256  }
  0x35   :  { %961 = vsyncadd [#allocation3], 4294967040 }
  0x36   :  { %962 = dma.done.wait [#allocation6], 288  }
  0x37   :  { %963 = vsyncadd [#allocation6], 4294967008  ;;  %v973_v0 = vmov 0   ;;  %v974_v1 = vmov 0.0|0.0   ;;  %v975_v2 = vmov 0.0   ;;  %vm190_vm0 = vcmask 254976  }
  0x38   :  { %846 = vset.pattern.permute.xlu0 %v973_v0  ;;  %812 = vmatprep.subr.bf16.mxu0 %v974_v1  ;;  %v69_v3 = vld [vmem:[%s1233_s0] sm:$0x3]  ;;  %v1077_v4 = vld [vmem:[#allocation2] sm:$0x3]  ;;  %v1083_v7 = vld [vmem:[#allocation2 + $0x2] sm:$0x3]  ;;  %v80_v39 = vlaneseq }
  0x39   :  { %847 = vset.pattern.permute.xlu1 %v973_v0  ;;  %782 = vmatprep.subr.mxu1 %v975_v2  ;;  %v745_v5 = vld [vmem:[%s1238_s5] ss:$0 sm:$0xff]  ;;  %v1086_v9 = vld [vmem:[#allocation2 + $0x4] sm:$0x3]  ;;  %v89_v12 = vld [vmem:[%s1237_s4 + $0x8] sm:$0xff]  ;;  %vm976_vm1 = vmmov 0  }
  0x3a   :  { %83 = vperm.xlu0 %846, %v69_v3   ;;  %v182_v6 = vmul.f32 %v745_v5, %v1077_v4  ;;  %v183_v8 = vmul.f32 %v745_v5, %v1083_v7  ;;  %v88_v11 = vld [vmem:[%s1237_s4] sm:$0xff]  ;;  %v184_v14 = vmul.f32 %v745_v5, %v1086_v9  ;;  %v90_v15 = vld [vmem:[%s1237_s4 + $0x10] sm:$0xff]  ;;  %v91_v16 = vld [vmem:[%s1237_s4 + $0x18] sm:$0xff]  ;;  %779 = vmatprep.mubr.msk.f32.mxu0 %vm976_vm1, %v975_v2  ;;  %vm174_vm2 = vcmask 123904   ;;  %s977_s30 = smov 16   ;;  %s978_s26 = smov 96  }
  0x3b   :  { %v1103_v17 = vld [vmem:[#allocation2 + $0x6] sm:$0x3]  ;;  %v813_v18 = vpack.c.bf16 %v89_v12, %v88_v11  ;;  %784 = vmatprep.mubr.msk.f32.mxu1 %vm976_vm1, %v975_v2  ;;  %v816_v19 = vpack.c.bf16 %v91_v16, %v90_v15  ;;  %v1112_v22 = vld [vmem:[#allocation2 + $0x8] sm:$0x3]  ;;  %v1117_v25 = vld [vmem:[#allocation2 + $0xa] sm:$0x3] }
  0x3c   :  { %v191_v10 = vsel %vm190_vm0, %v182_v6, 0.0  ;;  %v194_v13 = vsel %vm190_vm0, %v183_v8, 0.0  ;;  %v197_v20 = vsel %vm190_vm0, %v184_v14, 0.0  ;;  %v185_v21 = vmul.f32 %v745_v5, %v1103_v17  ;;  %v1121_v28 = vld [vmem:[#allocation2 + $0xc] sm:$0x3]  ;;  %s979_s27 = smov 112  }
  0x3d   :  { %192 = vadd.xlane.f32.xlu1 %v191_v10  ;;  %814 = vmatpush3.bf16.msra.mxu0 %v813_v18  ;;  %v186_v24 = vmul.f32 %v745_v5, %v1112_v22  ;;  %v187_v27 = vmul.f32 %v745_v5, %v1117_v25  ;;  %v188_v30 = vmul.f32 %v745_v5, %v1121_v28  ;;  %v1125_v31 = vld [vmem:[#allocation2 + $0xe] sm:$0x3]  ;;  %v1130_v32 = vld [vmem:[%s1235_s2] sm:$0x3]  ;;  %v81_v40 = vand.u32 127, %v80_v39  ;;  %s980_s28 = smov 80  }
  0x3e   :  { %815 = vmatprep.subr.bf16.mxu0 %v974_v1  ;;  %v200_v23 = vsel %vm190_vm0, %v185_v21, 0.0  ;;  %v744_v33 = vld [vmem:[%s1238_s5 + $0x1] ss:$0 sm:$0xff]  ;;  %v189_v35 = vmul.f32 %v745_v5, %v1125_v31  ;;  %vm92_vm3 = vcmask 261120   ;;  %v746_v51 = vld [vmem:[%s1238_s5 + $0x2] ss:$0 sm:$0xff] }
  0x3f   :  { %v203_v26 = vsel %vm190_vm0, %v186_v24, 0.0  ;;  %v206_v29 = vsel %vm190_vm0, %v187_v27, 0.0  ;;  %v209_v34 = vsel %vm190_vm0, %v188_v30, 0.0  ;;  %v173_v36 = vmul.f32 %v744_v33, %v1130_v32  ;;  %s981_s4 = smov [#allocation8]  }
  0x40   :  { %v212_v37 = vsel %vm190_vm0, %v189_v35, 0.0  ;;  %vm243_vm5 = vcmask 1024   ;;  %vm525_vm6 = vcmask 130048   ;;  %vm378_vm7 = vcmask 64512   ;;  %s732_s10 = sshll.u32 %s981_s4, 4  ;;  %s733_s10 = int_to_ptr.vmem [resolvable:$true] %s732_s10 }
  0x41   :  { %195 = vadd.xlane.f32.xlu1 %v194_v13  ;;  %817 = vmatpush3.bf16.msra.mxu0 %v816_v19  ;;  %v175_v38 = vsel %vm174_vm2, %v173_v36, 0.0  ;;  %vm721_vm8 = vcmask 392192   ;;  %vm723_vm9 = vcmask 523264   ;;  %p943_p11 = scmp.lt.s32.totalorder %s733_s10, %s733_s10 }
  0x42   :  { %824 = vmatprep.subr.bf16.mxu0 %v974_v1 }
  0x45   :  { %198 = vadd.xlane.f32.xlu1 %v197_v20 }
  0x49   :  { %201 = vadd.xlane.f32.xlu1 %v200_v23 }
  0x4d   :  { %204 = vadd.xlane.f32.xlu1 %v203_v26 }
  0x51   :  { %207 = vadd.xlane.f32.xlu1 %v206_v29 }
  0x55   :  { %210 = vadd.xlane.f32.xlu1 %v209_v34 }
  0x59   :  { %213 = vadd.xlane.f32.xlu1 %v212_v37  ;;  %176 = vadd.xlane.f32.xlu0 %v175_v38 }
  0xb9   :  { %v84_v41 = vpop.permute.xlu0 %83 }
  0xba   :  { %vm85_vm4 = vcmp.eq.s32.totalorder %v81_v40, %v84_v41 }
  0xbb   :  { %v742_v42 = vsel %vm85_vm4, 1.0, %v975_v2 }
  0xbc   :  { %780 = vmatmul.mubr.msk.f32.vlgmr.msra.gmra.mrb[0].mxu0 %vm92_vm3, %v742_v42 }
  0xbd   :  { %802 = vmatprep.mubr.msk.f32.mxu0 %vm976_vm1, %v975_v2 }
  0xca   :  { %v193_v43 = vpop.xlane.xlu1 %192 }
  0xce   :  { %v196_v44 = vpop.xlane.xlu1 %195 }
  0xd2   :  { %v199_v45 = vpop.xlane.xlu1 %198 }
  0xd6   :  { %v202_v46 = vpop.xlane.xlu1 %201 }
  0xda   :  { %v205_v47 = vpop.xlane.xlu1 %204 }
  0xde   :  { %v208_v48 = vpop.xlane.xlu1 %207 }
  0xe2   :  { %v211_v49 = vpop.xlane.xlu1 %210 }
  0xe6   :  { %v214_v50 = vpop.xlane.xlu1 %213  ;;  %v177_v52 = vpop.xlane.xlu0 %176 }
  0xe7   :  { %v215_v53 = vadd.f32 %v193_v43, %v177_v52  ;;  %v216_v54 = vadd.f32 %v196_v44, %v177_v52  ;;  %v217_v55 = vadd.f32 %v199_v45, %v177_v52  ;;  %v218_v56 = vadd.f32 %v202_v46, %v177_v52 }
  0xe8   :  { %v219_v57 = vadd.f32 %v205_v47, %v177_v52  ;;  %v220_v58 = vadd.f32 %v208_v48, %v177_v52  ;;  %v221_v59 = vadd.f32 %v211_v49, %v177_v52  ;;  %v222_v60 = vadd.f32 %v214_v50, %v177_v52 }
  0xe9   :  { %v227_v61 = vadd.f32 %v746_v51, %v215_v53  ;;  %v229_v62 = vadd.f32 %v746_v51, %v217_v55  ;;  %v230_v63 = vadd.f32 %v746_v51, %v218_v56  ;;  %v228_v0 = vadd.f32 %v746_v51, %v216_v54 }
  0xea   :  { %v231_v3 = vadd.f32 %v746_v51, %v219_v57  ;;  %v232_v5 = vadd.f32 %v746_v51, %v220_v58  ;;  %v233_v6 = vadd.f32 %v746_v51, %v221_v59  ;;  %v234_v8 = vadd.f32 %v746_v51, %v222_v60 }
  0xeb   :  { %v235_v10 = vmax.f32 %v227_v61, 0.0  ;;  %v237_v11 = vmax.f32 %v229_v62, 0.0  ;;  %v238_v12 = vmax.f32 %v230_v63, 0.0  ;;  %v236_v13 = vmax.f32 %v228_v0, 0.0 }
  0xec   :  { %v239_v14 = vmax.f32 %v231_v3, 0.0  ;;  %v240_v15 = vmax.f32 %v232_v5, 0.0  ;;  %v241_v16 = vmax.f32 %v233_v6, 0.0  ;;  %v242_v18 = vmax.f32 %v234_v8, 0.0 }
  0xed   :  { %v244_v19 = vsel %vm243_vm5, %v235_v10, -inf  ;;  %v246_v20 = vsel %vm243_vm5, %v237_v11, -inf  ;;  %v247_v21 = vsel %vm243_vm5, %v238_v12, -inf  ;;  %v245_v23 = vsel %vm243_vm5, %v236_v13, -inf }
  0xee   :  { %v248_v24 = vsel %vm243_vm5, %v239_v14, -inf  ;;  %v252_v26 = vsel %vm243_vm5, %v241_v16, -inf  ;;  %v254_v27 = vsel %vm243_vm5, %v242_v18, -inf  ;;  %v250_v29 = vsel %vm243_vm5, %v240_v15, -inf }
  0xef   :  { %v253_v30 = vmax.f32 %v246_v20, %v252_v26  ;;  %v255_v33 = vmax.f32 %v247_v21, %v254_v27  ;;  %v249_v34 = vmax.f32 %v244_v19, %v248_v24  ;;  %v251_v35 = vmax.f32 %v245_v23, %v250_v29 }
  0xf1   :  { %v256_v36 = vmax.f32 %v249_v34, %v251_v35  ;;  %v257_v37 = vmax.f32 %v253_v30, %v255_v33  ;;  %v375_v35 = vld [vmem:[%s1239_s6 + $0x28] sm:$0xff] }
  0xf3   :  { %v258_v38 = vmax.f32 %v256_v36, %v257_v37  ;;  %v376_v36 = vld [vmem:[%s1239_s6 + $0x30] sm:$0xff] }
  0xf4   :  { %v825_v37 = vpack.c.bf16 %v376_v36, %v375_v35  ;;  %v632_v35 = vld [vmem:[#allocation7] sm:$0xff]  ;;  %v633_v36 = vld [vmem:[#allocation7 + $0x8] sm:$0xff] }
  0xf5   :  { %v259_v39 = vsub.f32 %v235_v10, %v258_v38  ;;  %v260_v40 = vsub.f32 %v236_v13, %v258_v38  ;;  %v261_v41 = vsub.f32 %v237_v11, %v258_v38  ;;  %v262_v42 = vsub.f32 %v238_v12, %v258_v38 }
  0xf6   :  { %v263_v43 = vsub.f32 %v239_v14, %v258_v38  ;;  %v264_v47 = vsub.f32 %v240_v15, %v258_v38  ;;  %v265_v49 = vsub.f32 %v241_v16, %v258_v38  ;;  %v266_v51 = vsub.f32 %v242_v18, %v258_v38  ;;  %v374_v16 = vld [vmem:[%s1239_s6 + $0x20] sm:$0xff]  ;;  %v79_v38 = vld [vmem:[#allocation5] sm:$0x3]  ;;  %826 = vmatpush3.bf16.msra.mxu0 %v825_v37 }
  0xf7   :  { %v267_v44 = vmul.f32 1.442695, %v259_v39  ;;  %v269_v45 = vmul.f32 1.442695, %v260_v40  ;;  %v271_v46 = vmul.f32 1.442695, %v261_v41  ;;  %783 = vmatpush3.msra.mxu1 %v374_v16  ;;  %v828_v37 = vpack.c.bf16 %v633_v36, %v632_v35 }
  0xf8   :  { %v273_v48 = vmul.f32 1.442695, %v262_v42  ;;  %v275_v50 = vmul.f32 1.442695, %v263_v43  ;;  %v277_v52 = vmul.f32 1.442695, %v264_v47  ;;  %818 = vmatprep.subr.bf16.mxu1 %v974_v1 }
  0xf9   :  { %848 = vpow2.f32 %v267_v44  ;;  %v279_v53 = vmul.f32 1.442695, %v265_v49  ;;  %v281_v54 = vmul.f32 1.442695, %v266_v51  ;;  %803 = vmatmul.mubr.msk.f32.vlgmr.msra.gmra.mrb[2].mxu0 %vm525_vm6, %v1130_v32  ;;  %v370_v39 = vld [vmem:[%s1239_s6] sm:$0xff]  ;;  %v371_v40 = vld [vmem:[%s1239_s6 + $0x8] sm:$0xff] }
  0xfa   :  { %850 = vpow2.f32 %v269_v45  ;;  %v819_v41 = vpack.c.bf16 %v371_v40, %v370_v39  ;;  %v372_v42 = vld [vmem:[%s1239_s6 + $0x10] sm:$0xff]  ;;  %v373_v43 = vld [vmem:[%s1239_s6 + $0x18] sm:$0xff] }
  0xfb   :  { %852 = vpow2.f32 %v271_v46  ;;  %v822_v45 = vpack.c.bf16 %v373_v43, %v372_v42  ;;  %v751_v42 = vld [vmem:[%s1238_s5 + $0x4] ss:$0 sm:$0xff] }
  0xfc   :  { %854 = vpow2.f32 %v273_v48 }
  0xfd   :  { %856 = vpow2.f32 %v275_v50 }
  0xfe   :  { %858 = vpow2.f32 %v277_v52 }
  0xff   :  { %860 = vpow2.f32 %v279_v53 }
 0x100   :  { %862 = vpow2.f32 %v281_v54 }
 0x103   :  { %v849_v55 = vpop.eup %848 }
 0x104   :  { %v851_v56 = vpop.eup %850  ;;  %v283_v57 = vsel %vm243_vm5, %v849_v55, 0.0 }
 0x105   :  { %v853_v58 = vpop.eup %852  ;;  %v284_v59 = vsel %vm243_vm5, %v851_v56, 0.0 }
 0x106   :  { %v855_v60 = vpop.eup %854  ;;  %v285_v61 = vadd.f32 %v284_v59, %v283_v57  ;;  %v286_v62 = vsel %vm243_vm5, %v853_v58, 0.0 }
 0x107   :  { %v857_v63 = vpop.eup %856  ;;  %v288_v3 = vsel %vm243_vm5, %v855_v60, 0.0 }
 0x108   :  { %v287_v0 = vadd.f32 %v286_v62, %v285_v61  ;;  %v859_v5 = vpop.eup %858  ;;  %v290_v8 = vsel %vm243_vm5, %v857_v63, 0.0 }
 0x109   :  { %v861_v10 = vpop.eup %860  ;;  %v292_v12 = vsel %vm243_vm5, %v859_v5, 0.0 }
 0x10a   :  { %v289_v6 = vadd.f32 %v288_v3, %v287_v0  ;;  %v863_v13 = vpop.eup %862  ;;  %v294_v15 = vsel %vm243_vm5, %v861_v10, 0.0 }
 0x10b   :  { %v296_v19 = vsel %vm243_vm5, %v863_v13, 0.0 }
 0x10c   :  { %v291_v11 = vadd.f32 %v290_v8, %v289_v6 }
 0x10e   :  { %v293_v14 = vadd.f32 %v292_v12, %v291_v11 }
 0x110   :  { %v295_v18 = vadd.f32 %v294_v15, %v293_v14 }
 0x112   :  { %v297_v20 = vadd.f32 %v296_v19, %v295_v18 }
 0x114   :  { %864 = vrcp.f32 %v297_v20 }
 0x11e   :  { %v865_v21 = vpop.eup %864 }
 0x11f   :  { %v300_v23 = vmul.f32 %v865_v21, %v851_v56  ;;  %v299_v24 = vmul.f32 %v865_v21, %v849_v55  ;;  %v303_v26 = vmul.f32 %v865_v21, %v857_v63  ;;  %v301_v27 = vmul.f32 %v865_v21, %v853_v58 }
 0x120   :  { %v305_v29 = vmul.f32 %v865_v21, %v861_v10  ;;  %v302_v30 = vmul.f32 %v865_v21, %v855_v60  ;;  %v304_v33 = vmul.f32 %v865_v21, %v859_v5  ;;  %v306_v34 = vmul.f32 %v865_v21, %v863_v13 }
 0x121   :  { %314 = vperm.xlu0 %846, %v300_v23   ;;  %309 = vperm.xlu1 %847, %v299_v24  }
 0x125   :  { %329 = vperm.xlu0 %846, %v303_v26   ;;  %319 = vperm.xlu1 %847, %v301_v27  }
 0x129   :  { %339 = vperm.xlu0 %846, %v305_v29   ;;  %324 = vperm.xlu1 %847, %v302_v30  }
 0x12d   :  { %334 = vperm.xlu1 %847, %v304_v33  }
 0x131   :  { %344 = vperm.xlu1 %847, %v306_v34  }
 0x135   :  { %611 = vrot.lane.b32.xlu1 %v79_v38, %s977_s30 }
 0x18f   :  { %v162_v44 = vpop.f32.mrb[0].mxu0 }
 0x190   :  { %v781_v32 = vpop.f32.mrb[1].mxu0  ;;  %785 = vmatmul.mubr.msk.f32.vlgmr.msra.gmra.mrb[0].mxu1 %vm378_vm7, %v162_v44 }
 0x191   :  { %820 = vmatpush3.bf16.msra.mxu1 %v819_v41  ;;  %795 = vmatprep.mubr.msk.f32.mxu1 %vm976_vm1, %v975_v2 }
 0x192   :  { %821 = vmatprep.subr.bf16.mxu1 %v974_v1 }
 0x195   :  { %823 = vmatpush3.bf16.msra.mxu1 %v822_v45 }
 0x196   :  { %827 = vmatprep.subr.bf16.mxu1 %v974_v1 }
 0x1a0   :  { %v315_v46 = vpop.permute.xlu0 %314  ;;  %v310_v47 = vpop.permute.xlu1 %309 }
 0x1a1   :  { %v348_v48 = vmul.f32 %v315_v46, %v1083_v7  ;;  %v347_v49 = vmul.f32 %v310_v47, %v1077_v4 }
 0x1a3   :  { %v356_v52 = vsel %vm190_vm0, %v348_v48, 0.0  ;;  %v355_v53 = vsel %vm190_vm0, %v347_v49, 0.0 }
 0x1a4   :  { %v330_v50 = vpop.permute.xlu0 %329  ;;  %v320_v51 = vpop.permute.xlu1 %319  ;;  %v357_v56 = vadd.f32 %v356_v52, %v355_v53 }
 0x1a5   :  { %v349_v54 = vmul.f32 %v320_v51, %v1086_v9  ;;  %v351_v1 = vmul.f32 %v330_v50, %v1112_v22 }
 0x1a7   :  { %v358_v55 = vsel %vm190_vm0, %v349_v54, 0.0  ;;  %v362_v62 = vsel %vm190_vm0, %v351_v1, 0.0 }
 0x1a8   :  { %v325_v57 = vpop.permute.xlu1 %324  ;;  %v359_v59 = vadd.f32 %v358_v55, %v357_v56  ;;  %v340_v7 = vpop.permute.xlu0 %339 }
 0x1a9   :  { %v350_v58 = vmul.f32 %v325_v57, %v1103_v17  ;;  %v353_v63 = vmul.f32 %v340_v7, %v1121_v28 }
 0x1ab   :  { %v360_v4 = vsel %vm190_vm0, %v350_v58, 0.0  ;;  %v366_v22 = vsel %vm190_vm0, %v353_v63, 0.0 }
 0x1ac   :  { %v361_v60 = vadd.f32 %v360_v4, %v359_v59  ;;  %v335_v61 = vpop.permute.xlu1 %334 }
 0x1ad   :  { %v352_v9 = vmul.f32 %v335_v61, %v1117_v25 }
 0x1ae   :  { %v363_v0 = vadd.f32 %v362_v62, %v361_v60 }
 0x1af   :  { %v364_v3 = vsel %vm190_vm0, %v352_v9, 0.0 }
 0x1b0   :  { %v365_v5 = vadd.f32 %v364_v3, %v363_v0  ;;  %v345_v6 = vpop.permute.xlu1 %344 }
 0x1b1   :  { %v354_v17 = vmul.f32 %v345_v6, %v1125_v31  ;;  %v750_v31 = vld [vmem:[%s1238_s5 + $0x3] ss:$0 sm:$0xff] }
 0x1b2   :  { %v367_v8 = vadd.f32 %v366_v22, %v365_v5 }
 0x1b3   :  { %v368_v10 = vsel %vm190_vm0, %v354_v17, 0.0 }
 0x1b4   :  { %v369_v11 = vadd.f32 %v368_v10, %v367_v8  ;;  %v612_v29 = vpop.permute.xlu1 %611 }
 0x1b6   :  { %796 = vmatmul.mubr.msk.f32.vlgmr.msra.gmra.mrb[2].mxu1 %vm92_vm3, %v369_v11 }
 0x1b7   :  { %809 = vmatprep.mubr.msk.f32.mxu1 %vm976_vm1, %v975_v2  ;;  %829 = vmatpush3.bf16.msra.mxu1 %v828_v37 }
 0x1cc   :  { %v595_v28 = vpop.f32.mrb[2].mxu0 }
 0x1cd   :  { %v804_v25 = vpop.f32.mrb[3].mxu0 }
 0x263   :  { %v448_v12 = vpop.f32.mrb[0].mxu1 }
 0x264   :  { %v786_v13 = vpop.f32.mrb[1].mxu1 }
 0x289   :  { %v521_v14 = vpop.f32.mrb[2].mxu1 }
 0x28a   :  { %v522_v15 = vadd.f32 %v521_v14, %v448_v12  ;;  %v797_v16 = vpop.f32.mrb[3].mxu1 }
 0x28c   :  { %v599_v18 = vadd.f32 %v595_v28, %v522_v15 }
 0x28e   :  { %v604_v19 = vadd.f32 %v750_v31, %v599_v18 }
 0x290   :  { %866 = vtanh.f32 %v604_v19  ;;  %v605_v21 = vmul.f32 0.5, %v604_v19 }
 0x292   :  { %868 = vtanh.f32 %v605_v21 }
 0x29a   :  { %v867_v20 = vpop.eup %866 }
 0x29b   :  { %616 = vrot.lane.b32.xlu0 %v867_v20, %s978_s26 }
 0x29c   :  { %v869_v2 = vpop.eup %868 }
 0x29d   :  { %v607_v23 = vadd.f32 1.0, %v869_v2 }
 0x29f   :  { %v608_v24 = vmul.f32 0.5, %v607_v23 }
 0x2a1   :  { %v614_v30 = vmul.f32 %v612_v29, %v608_v24 }
 0x30d   :  { %v617_v26 = vpop.permute.xlu0 %616 }
 0x30e   :  { %v619_v27 = vmul.f32 %v617_v26, %v608_v24 }
 0x310   :  { %621 = vrot.lane.b32.xlu0 %v619_v27, %s977_s30 }
 0x382   :  { %v622_v33 = vpop.permute.xlu0 %621 }
 0x383   :  { %v624_v34 = vadd.f32 %v622_v33, %v614_v30 }
 0x385   :  { %870 = vtanh.f32 %v624_v34 }
 0x38f   :  { %v871_v38 = vpop.eup %870 }
 0x390   :  { %627 = vrot.lane.b32.xlu1 %v871_v38, %s968_s3 }
 0x402   :  { %v628_v39 = vpop.permute.xlu1 %627 }
 0x403   :  { %v630_v40 = vmul.f32 %v628_v39, %v608_v24 }
 0x405   :  { %713 = vrot.lane.b32.xlu1 %v630_v40, %s979_s27  ;;  %639 = vrot.lane.b32.xlu0 %v630_v40, %s980_s28 }
 0x409   :  { %717 = vrot.lane.b32.xlu0 %v624_v34, %s968_s3  ;;  %s938_s3 = scalar_lea.vmem %s733_s10, 32 }
 0x40a   :  { %p939_p10 = scmp.ne.s32.totalorder %s733_s10, %s938_s3  ;;  %p944_p12 = scmp.lt.s32.totalorder %s938_s3, %s938_s3 }
 0x40c   :  { %p945_p13 = por %p944_p12, %p943_p11 }
 0x40e   :  { %p946_p0 = pnand %p945_p13, %p939_p10 }
 0x477   :  { %v640_v41 = vpop.permute.xlu0 %639  ;;  %v714_v45 = vpop.permute.xlu1 %713 }
 0x478   :  { %810 = vmatmul.mubr.msk.f32.vlgmr.msra.gmra.mrb[4].mxu1 %vm525_vm6, %v640_v41 }
 0x47b   :  { %v718_v46 = vpop.permute.xlu0 %717 }
 0x54b   :  { %v709_v43 = vpop.f32.mrb[4].mxu1 }
 0x54c   :  { %v710_v44 = vadd.f32 %v751_v42, %v709_v43  ;;  %v811_v32 = vpop.f32.mrb[5].mxu1 }
 0x54e   :  { %v720_v47 = vsel %vm92_vm3, %v710_v44, %v714_v45 }
 0x54f   :  { %v722_v48 = vsel %vm721_vm8, %v720_v47, %v718_v46 }
 0x550   :  { %v724_v49 = vsel %vm723_vm9, %v722_v48, 0.0 }
 0x551   :  { %725 = vst [vmem:[#allocation8] sm:$0x3] %v724_v49 }
 0x552   :  { %949 = shalt.err (!%p946_p0)
}
 0x553   :  { %s950_s12 = scalar_lea.hbm %s1241_s8, 32 }
 0x554   :  { %p951_p1 = scmp.ne.s32.totalorder %s1241_s8, %s950_s12  ;;  %p954_p2 = scmp.lt.u32.totalorder %s950_s12, %s1241_s8 }
 0x556   :  { %p956_p3 = pnand %p954_p2, %p951_p1 }
 0x558   :  { %959 = shalt.err (!%p956_p3)
}
 0x559   :  { %735 = dma.vmem_to_hbm [thread:$0]  %s733_s10, 32, %s1241_s8, [#allocation4]  }
 0x55a   :  { %964 = dma.done.wait [#allocation4], 32  }
 0x55b   :  { %965 = vsyncadd [#allocation4], 4294967264 }
 0x55c   :  { %739 = vsyncpa [#allocation3], 1 }
 0x55d   :  { %740 = vsyncpa [#allocation6], 1 }
 0x55e   :  { %741 = vsyncpa [#allocation4], 1 }

</bundles_post_ra>
